<compile_context>
chip_gen: v7x
topology: tpu7x:2x2x1
jax: 0.10.0
libtpu: 0.0.40
codegen_flags: <defaults>
</compile_context>

<pallas_src>
import functools

import jax
import jax.numpy as jnp
from jax.experimental import pallas as pl
from jax.experimental.pallas import tpu as pltpu

INPUT_DIM = 60
HIDDEN_DIM = 100
OUTPUT_DIM = 60
PAD_DIM = 128  # lane-dense padded feature width used *inside* the kernel only


def _round_up(n, m):
    return ((n + m - 1) // m) * m


def _mlp_kernel(x_ref, w1_ref, b1_ref, w2_ref, b2_ref, w3_ref, b3_ref,
                w5_ref, b5_ref, o_ref):
    cdt = w1_ref.dtype               # compute dtype for the matmul operands
    tile = x_ref.shape[0]

    # Cast f32 HBM stream -> compute dtype and pad 60 -> 128 lanes in VMEM with zeros
    # so the first matmul sees a clean (tile,128) x (128,128) MXU shape.  Padded lanes
    # are zero and padded weight rows/cols + biases are zero, so nothing leaks.
    x = x_ref[...].astype(cdt)
    xp = jnp.concatenate(
        [x, jnp.zeros((tile, PAD_DIM - INPUT_DIM), dtype=cdt)], axis=1)

    # fc1 + LeakyReLU (PyTorch default negative_slope = 0.01)
    h = jnp.dot(xp, w1_ref[...], preferred_element_type=jnp.float32) + b1_ref[...]
    h = jnp.where(h > 0, h, 0.01 * h)

    # fc2 + ReLU
    h = jnp.dot(h.astype(cdt), w2_ref[...],
                preferred_element_type=jnp.float32) + b2_ref[...]
    h = jnp.maximum(h, 0.0)

    # fc3 + ReLU
    h = jnp.dot(h.astype(cdt), w3_ref[...],
                preferred_element_type=jnp.float32) + b3_ref[...]
    h = jnp.maximum(h, 0.0)

    # fc5 (no activation) -- w5 is (128, 60) so the result is already real-width.
    out = jnp.dot(h.astype(cdt), w5_ref[...],
                  preferred_element_type=jnp.float32) + b5_ref[...]
    o_ref[...] = out.astype(o_ref.dtype)


def prepare_params(params, compute_dtype=jnp.bfloat16):
    """Pad/cast weights & biases ONCE (cache the result; do not redo per forward).

    Weights -> compute_dtype (default bf16: ~2x MXU throughput on v6e/v7x, removes the
    MXU bottleneck on v5e).  Biases stay f32 (added after f32 accumulation).
    """
    cdt = jnp.dtype(compute_dtype)

    def pad_w(w, n_pad):
        k, n = w.shape
        return jnp.pad(w, ((0, PAD_DIM - k), (0, n_pad - n))).astype(cdt)

    def pad_b(b, n_pad):
        return jnp.pad(b, ((0, 0), (0, n_pad - b.shape[1]))).astype(jnp.float32)

    return dict(
        w1=pad_w(params["w1"], PAD_DIM), b1=pad_b(params["b1"], PAD_DIM),
        w2=pad_w(params["w2"], PAD_DIM), b2=pad_b(params["b2"], PAD_DIM),
        w3=pad_w(params["w3"], PAD_DIM), b3=pad_b(params["b3"], PAD_DIM),
        w5=pad_w(params["w5"], OUTPUT_DIM), b5=pad_b(params["b5"], OUTPUT_DIM),
    )


@functools.partial(jax.jit,
                   static_argnames=("tile_m", "out_dtype", "vmem_limit_bytes"))
def feedforward_nn(x, prepped, tile_m=2048, out_dtype=jnp.float32,
                   vmem_limit_bytes=None):
    """Fused MLP forward. x: [B, 60] f32. Returns [B, 60] in out_dtype (default f32).

    prepped: output of prepare_params() (padded/cast weights, computed once).
    tile_m: batch tile (multiple of 8; sweep 1024/2048/4096; set vmem_limit_bytes when
            sweeping past ~4096 f32 / ~8192 bf16, especially on v7x's 64 MiB VMEM).
    out_dtype: set jnp.bfloat16 if the consumer tolerates it to halve the output stream.
    """
    B, D_in = x.shape
    assert D_in == INPUT_DIM

    # Effective batch tile: multiple of 8, no larger than needed, and capped so the
    # grid has >= 2 steps when the batch allows (keeps both v7x TensorCores busy).
    eff_tile = max(8, _round_up(min(int(tile_m), B), 8))
    if B > 8:
        eff_tile = min(eff_tile, _round_up(pl.cdiv(B, 2), 8))
    grid_m = pl.cdiv(B, eff_tile)   # ragged last block: OOB reads garbage, writes dropped

    p = prepped

    def resident(arr):
        # Whole-array block, constant index_map: stays resident in VMEM across grid
        # steps (no per-step re-DMA).  (pipeline_mode=pl.Buffered(1) would trim the
        # redundant second buffer; skipped — negligible here.)
        return pl.BlockSpec(arr.shape, lambda i: (0, 0))

    in_bytes = B * INPUT_DIM * x.dtype.itemsize
    out_bytes = B * OUTPUT_DIM * jnp.dtype(out_dtype).itemsize
    w_bytes = sum(int(v.size) * v.dtype.itemsize for v in p.values())
    cost = pl.CostEstimate(
        flops=2 * B * (INPUT_DIM * HIDDEN_DIM
                       + 2 * HIDDEN_DIM * HIDDEN_DIM
                       + HIDDEN_DIM * OUTPUT_DIM),
        transcendentals=0,
        bytes_accessed=in_bytes + out_bytes + w_bytes,
    )

    out = pl.pallas_call(
        _mlp_kernel,
        out_shape=jax.ShapeDtypeStruct((B, OUTPUT_DIM), jnp.dtype(out_dtype)),
        grid_spec=pltpu.PrefetchScalarGridSpec(
            num_scalar_prefetch=0,
            grid=(grid_m,),
            in_specs=[
                # x streams at its real 60-wide f32 width (last dim == full array dim).
                pl.BlockSpec((eff_tile, INPUT_DIM), lambda i: (i, 0)),
                resident(p["w1"]), resident(p["b1"]),
                resident(p["w2"]), resident(p["b2"]),
                resident(p["w3"]), resident(p["b3"]),
                resident(p["w5"]), resident(p["b5"]),
            ],
            out_specs=pl.BlockSpec((eff_tile, OUTPUT_DIM), lambda i: (i, 0)),
        ),
        compiler_params=pltpu.CompilerParams(
            dimension_semantics=("parallel",),
            vmem_limit_bytes=vmem_limit_bytes),
        cost_estimate=cost,
    )(x, p["w1"], p["b1"], p["w2"], p["b2"], p["w3"], p["b3"], p["w5"], p["b5"])

    return out


def init_params(key):
    """Deterministic init mimicking nn.Linear's U(-1/sqrt(fan_in), 1/sqrt(fan_in))."""
    def linear(key, fan_in, fan_out):
        kw, kb = jax.random.split(key)
        bound = 1.0 / jnp.sqrt(float(fan_in))
        w = jax.random.uniform(kw, (fan_in, fan_out), jnp.float32, -bound, bound)
        b = jax.random.uniform(kb, (1, fan_out), jnp.float32, -bound, bound)
        return w, b

    k1, k2, k3, k5 = jax.random.split(key, 4)
    w1, b1 = linear(k1, INPUT_DIM, HIDDEN_DIM)
    w2, b2 = linear(k2, HIDDEN_DIM, HIDDEN_DIM)
    w3, b3 = linear(k3, HIDDEN_DIM, HIDDEN_DIM)
    w5, b5 = linear(k5, HIDDEN_DIM, OUTPUT_DIM)
    return dict(w1=w1, b1=b1, w2=w2, b2=b2, w3=w3, b3=b3, w5=w5, b5=b5)


def reference_forward(x, p):
    h = x @ p["w1"] + p["b1"]
    h = jnp.where(h > 0, h, 0.01 * h)
    h = jnp.maximum(h @ p["w2"] + p["b2"], 0.0)
    h = jnp.maximum(h @ p["w3"] + p["b3"], 0.0)
    return h @ p["w5"] + p["b5"]


if __name__ == "__main__":
    key = jax.random.PRNGKey(0)
    kx, kp = jax.random.split(key)
    params = init_params(kp)

    batch = 16
    x = jax.random.normal(kx, (batch, INPUT_DIM), jnp.float32)
    ref = reference_forward(x, params)

    # f32 compute path: near bit-exact vs the reference.
    p_f32 = prepare_params(params, compute_dtype=jnp.float32)
    out_f32 = jax.block_until_ready(feedforward_nn(x, p_f32))
    assert out_f32.shape == (batch, OUTPUT_DIM)
    assert jnp.allclose(out_f32, ref, atol=1e-5, rtol=1e-5), "f32 mismatch vs reference"

    # bf16 operand path (default fast path on v5e/v6e/v7x): looser tolerance.
    p_bf16 = prepare_params(params)  # bfloat16 operands, f32 accumulation
    out_bf16 = jax.block_until_ready(feedforward_nn(x, p_bf16))
    assert jnp.allclose(out_bf16, ref, atol=5e-2, rtol=5e-2), "bf16 mismatch"

    # Non-multiple-of-8 batch exercises the ragged last grid block (no wrapper padding).
    x2 = jax.random.normal(kx, (50, INPUT_DIM), jnp.float32)
    ref2 = reference_forward(x2, params)
    out2 = jax.block_until_ready(feedforward_nn(x2, p_f32))
    assert out2.shape == (50, OUTPUT_DIM)
    assert jnp.allclose(out2, ref2, atol=1e-5, rtol=1e-5), "ragged-batch mismatch"

    print("KERNEL_OK")
</pallas_src>

<mosaic_0001>
module attributes {stable_mosaic.version = 11 : i64} {
  func.func @_mlp_kernel(%arg0: i32, %arg1: memref<8x60xf32, #tpu.memory_space<vmem>>, %arg2: memref<128x128xf32, #tpu.memory_space<vmem>>, %arg3: memref<1x128xf32, #tpu.memory_space<vmem>>, %arg4: memref<128x128xf32, #tpu.memory_space<vmem>>, %arg5: memref<1x128xf32, #tpu.memory_space<vmem>>, %arg6: memref<128x128xf32, #tpu.memory_space<vmem>>, %arg7: memref<1x128xf32, #tpu.memory_space<vmem>>, %arg8: memref<128x60xf32, #tpu.memory_space<vmem>>, %arg9: memref<1x60xf32, #tpu.memory_space<vmem>>, %arg10: memref<8x60xf32, #tpu.memory_space<vmem>>) attributes {dimension_semantics = [#tpu.dimension_semantics<parallel>], iteration_bounds = array<i64: 2>, scalar_prefetch = 0 : i64, scratch_operands = 0 : i64, tpu.core_type = #tpu.core_type<tc>, window_params = [{transform_indices = @transform_0, window_bounds = array<i64: 8, 60>}, {pipeline_mode = #tpu.pipeline_mode<synchronous>, transform_indices = @transform_1, window_bounds = array<i64: 128, 128>}, {pipeline_mode = #tpu.pipeline_mode<synchronous>, transform_indices = @transform_2, window_bounds = array<i64: 1, 128>}, {pipeline_mode = #tpu.pipeline_mode<synchronous>, transform_indices = @transform_3, window_bounds = array<i64: 128, 128>}, {pipeline_mode = #tpu.pipeline_mode<synchronous>, transform_indices = @transform_4, window_bounds = array<i64: 1, 128>}, {pipeline_mode = #tpu.pipeline_mode<synchronous>, transform_indices = @transform_5, window_bounds = array<i64: 128, 128>}, {pipeline_mode = #tpu.pipeline_mode<synchronous>, transform_indices = @transform_6, window_bounds = array<i64: 1, 128>}, {pipeline_mode = #tpu.pipeline_mode<synchronous>, transform_indices = @transform_7, window_bounds = array<i64: 128, 60>}, {pipeline_mode = #tpu.pipeline_mode<synchronous>, transform_indices = @transform_8, window_bounds = array<i64: 1, 60>}, {transform_indices = @transform_9, window_bounds = array<i64: 8, 60>}]} {
    %c0 = arith.constant 0 : index
    %c0_0 = arith.constant 0 : index
    %0 = vector.load %arg1[%c0, %c0_0] : memref<8x60xf32, #tpu.memory_space<vmem>>, vector<8x60xf32>
    %cst = arith.constant 0.000000e+00 : f32
    %1 = vector.broadcast %cst : f32 to vector<8x68xf32>
    %2 = tpu.concatenate %0, %1 in 1 : vector<8x60xf32>, vector<8x68xf32> -> vector<8x128xf32>
    %c0_1 = arith.constant 0 : index
    %c0_2 = arith.constant 0 : index
    %3 = vector.load %arg2[%c0_1, %c0_2] : memref<128x128xf32, #tpu.memory_space<vmem>>, vector<128x128xf32>
    %cst_3 = arith.constant dense<0.000000e+00> : vector<8x128xf32>
    %4 = tpu.matmul %2, %3, %cst_3 {dimension_numbers = #tpu.dot_dimension_numbers<[1], [0], [0], [1], [0, 0, 1, 1], [], []>} : vector<8x128xf32>, vector<128x128xf32>, vector<8x128xf32> -> vector<8x128xf32>
    %c0_4 = arith.constant 0 : index
    %c0_5 = arith.constant 0 : index
    %5 = vector.load %arg3[%c0_4, %c0_5] : memref<1x128xf32, #tpu.memory_space<vmem>>, vector<1x128xf32>
    %6 = vector.broadcast %5 : vector<1x128xf32> to vector<8x128xf32>
    %7 = arith.addf %4, %6 : vector<8x128xf32>
    %cst_6 = arith.constant 0.000000e+00 : f32
    %8 = vector.broadcast %cst_6 : f32 to vector<8x128xf32>
    %9 = arith.cmpf ogt, %7, %8 : vector<8x128xf32>
    %cst_7 = arith.constant 0.00999999977 : f32
    %10 = vector.broadcast %cst_7 : f32 to vector<8x128xf32>
    %11 = arith.mulf %10, %7 : vector<8x128xf32>
    %12 = arith.select %9, %7, %11 : vector<8x128xi1>, vector<8x128xf32>
    %c0_8 = arith.constant 0 : index
    %c0_9 = arith.constant 0 : index
    %13 = vector.load %arg4[%c0_8, %c0_9] : memref<128x128xf32, #tpu.memory_space<vmem>>, vector<128x128xf32>
    %cst_10 = arith.constant dense<0.000000e+00> : vector<8x128xf32>
    %14 = tpu.matmul %12, %13, %cst_10 {dimension_numbers = #tpu.dot_dimension_numbers<[1], [0], [0], [1], [0, 0, 1, 1], [], []>} : vector<8x128xf32>, vector<128x128xf32>, vector<8x128xf32> -> vector<8x128xf32>
    %c0_11 = arith.constant 0 : index
    %c0_12 = arith.constant 0 : index
    %15 = vector.load %arg5[%c0_11, %c0_12] : memref<1x128xf32, #tpu.memory_space<vmem>>, vector<1x128xf32>
    %16 = vector.broadcast %15 : vector<1x128xf32> to vector<8x128xf32>
    %17 = arith.addf %14, %16 : vector<8x128xf32>
    %cst_13 = arith.constant 0.000000e+00 : f32
    %18 = vector.broadcast %cst_13 : f32 to vector<8x128xf32>
    %19 = arith.maximumf %17, %18 : vector<8x128xf32>
    %c0_14 = arith.constant 0 : index
    %c0_15 = arith.constant 0 : index
    %20 = vector.load %arg6[%c0_14, %c0_15] : memref<128x128xf32, #tpu.memory_space<vmem>>, vector<128x128xf32>
    %cst_16 = arith.constant dense<0.000000e+00> : vector<8x128xf32>
    %21 = tpu.matmul %19, %20, %cst_16 {dimension_numbers = #tpu.dot_dimension_numbers<[1], [0], [0], [1], [0, 0, 1, 1], [], []>} : vector<8x128xf32>, vector<128x128xf32>, vector<8x128xf32> -> vector<8x128xf32>
    %c0_17 = arith.constant 0 : index
    %c0_18 = arith.constant 0 : index
    %22 = vector.load %arg7[%c0_17, %c0_18] : memref<1x128xf32, #tpu.memory_space<vmem>>, vector<1x128xf32>
    %23 = vector.broadcast %22 : vector<1x128xf32> to vector<8x128xf32>
    %24 = arith.addf %21, %23 : vector<8x128xf32>
    %cst_19 = arith.constant 0.000000e+00 : f32
    %25 = vector.broadcast %cst_19 : f32 to vector<8x128xf32>
    %26 = arith.maximumf %24, %25 : vector<8x128xf32>
    %c0_20 = arith.constant 0 : index
    %c0_21 = arith.constant 0 : index
    %27 = vector.load %arg8[%c0_20, %c0_21] : memref<128x60xf32, #tpu.memory_space<vmem>>, vector<128x60xf32>
    %cst_22 = arith.constant dense<0.000000e+00> : vector<8x60xf32>
    %28 = tpu.matmul %26, %27, %cst_22 {dimension_numbers = #tpu.dot_dimension_numbers<[1], [0], [0], [1], [0, 0, 1, 1], [], []>} : vector<8x128xf32>, vector<128x60xf32>, vector<8x60xf32> -> vector<8x60xf32>
    %c0_23 = arith.constant 0 : index
    %c0_24 = arith.constant 0 : index
    %29 = vector.load %arg9[%c0_23, %c0_24] : memref<1x60xf32, #tpu.memory_space<vmem>>, vector<1x60xf32>
    %30 = vector.broadcast %29 : vector<1x60xf32> to vector<8x60xf32>
    %31 = arith.addf %28, %30 : vector<8x60xf32>
    %c0_25 = arith.constant 0 : index
    %c0_26 = arith.constant 0 : index
    %32 = vector.load %arg10[%c0_25, %c0_26] : memref<8x60xf32, #tpu.memory_space<vmem>>, vector<8x60xf32>
    tpu.vector_store %arg10[%c0_25, %c0_26], %31 {strides = array<i32>} : memref<8x60xf32, #tpu.memory_space<vmem>>, vector<8x60xf32>,
    return
  }
  func.func @transform_0(%arg0: i32) -> (i32, i32) {
    %c0_i32 = arith.constant 0 : i32
    %c0_i32_0 = arith.constant 0 : i32
    return %arg0, %c0_i32 : i32, i32
  }
  func.func @transform_1(%arg0: i32) -> (i32, i32) {
    %c0_i32 = arith.constant 0 : i32
    %c0_i32_0 = arith.constant 0 : i32
    %c0_i32_1 = arith.constant 0 : i32
    return %c0_i32, %c0_i32_0 : i32, i32
  }
  func.func @transform_2(%arg0: i32) -> (i32, i32) {
    %c0_i32 = arith.constant 0 : i32
    %c0_i32_0 = arith.constant 0 : i32
    %c0_i32_1 = arith.constant 0 : i32
    return %c0_i32, %c0_i32_0 : i32, i32
  }
  func.func @transform_3(%arg0: i32) -> (i32, i32) {
    %c0_i32 = arith.constant 0 : i32
    %c0_i32_0 = arith.constant 0 : i32
    %c0_i32_1 = arith.constant 0 : i32
    return %c0_i32, %c0_i32_0 : i32, i32
  }
  func.func @transform_4(%arg0: i32) -> (i32, i32) {
    %c0_i32 = arith.constant 0 : i32
    %c0_i32_0 = arith.constant 0 : i32
    %c0_i32_1 = arith.constant 0 : i32
    return %c0_i32, %c0_i32_0 : i32, i32
  }
  func.func @transform_5(%arg0: i32) -> (i32, i32) {
    %c0_i32 = arith.constant 0 : i32
    %c0_i32_0 = arith.constant 0 : i32
    %c0_i32_1 = arith.constant 0 : i32
    return %c0_i32, %c0_i32_0 : i32, i32
  }
  func.func @transform_6(%arg0: i32) -> (i32, i32) {
    %c0_i32 = arith.constant 0 : i32
    %c0_i32_0 = arith.constant 0 : i32
    %c0_i32_1 = arith.constant 0 : i32
    return %c0_i32, %c0_i32_0 : i32, i32
  }
  func.func @transform_7(%arg0: i32) -> (i32, i32) {
    %c0_i32 = arith.constant 0 : i32
    %c0_i32_0 = arith.constant 0 : i32
    %c0_i32_1 = arith.constant 0 : i32
    return %c0_i32, %c0_i32_0 : i32, i32
  }
  func.func @transform_8(%arg0: i32) -> (i32, i32) {
    %c0_i32 = arith.constant 0 : i32
    %c0_i32_0 = arith.constant 0 : i32
    %c0_i32_1 = arith.constant 0 : i32
    return %c0_i32, %c0_i32_0 : i32, i32
  }
  func.func @transform_9(%arg0: i32) -> (i32, i32) {
    %c0_i32 = arith.constant 0 : i32
    %c0_i32_0 = arith.constant 0 : i32
    return %arg0, %c0_i32 : i32, i32
  }
}

</mosaic_0001>

<bundles_post_ra>
// kernel: feedforward_nn.1
= control target key start
LH: loop header
LB: loop body
LE: loop exit
PB: predicated region body
PF: predicated region fallthrough
CT: control target
= control target key end

     0   :  { %14 = vsyncpa [#allocation3], 0  ;;  %s1730_s0 = inlined_call_operand.vmem [shape: f32[16,60], index: 0, kind: input, shape index: {}]   ;;  %s1731_s1 = inlined_call_operand.vmem [shape: f32[128,128], index: 1, kind: input, shape index: {}]   ;;  %s1732_s2 = inlined_call_operand.vmem [shape: f32[1,128], index: 2, kind: input, shape index: {}]   ;;  %s1733_s3 = inlined_call_operand.hbm [shape: f32[128,128], index: 3, kind: input, shape index: {}]   ;;  %s1734_s4 = inlined_call_operand.vmem [shape: f32[1,128], index: 4, kind: input, shape index: {}]   ;;  %s1735_s5 = inlined_call_operand.hbm [shape: f32[128,128], index: 5, kind: input, shape index: {}]   ;;  %s1736_s6 = inlined_call_operand.vmem [shape: f32[1,128], index: 6, kind: input, shape index: {}]   ;;  %s1737_s7 = inlined_call_operand.vmem [shape: f32[128,60], index: 7, kind: input, shape index: {}]   ;;  %s1738_s8 = inlined_call_operand.vmem [shape: f32[1,60], index: 8, kind: input, shape index: {}]   ;;  %s1739_s9 = inlined_call_operand.hbm [shape: f32[16,60], index: 9, kind: output, shape index: {}]  }
   0x1   :  { %15 = vsyncpa [#allocation6], 0 }
   0x2   :  { %16 = vsyncpa [#allocation4], 0 }
   0x3   :  { %18 = vsyncpa [#allocation4 + $0x1], 0  ;;  %s1408_s30 = smov 0   ;;  %s1410_s10 = smov 0  }
   0x4   :  { %s1412_s11 = smov 0   ;;  %s1414_s12 = smov 0  }
   0x5 LB: > { %1746 = sst [smem:[#allocation11_spill]] %s1344_s11  ;;  %s1429_s13 = sadd.s32 4294967295, %s1348_s12   ;;  %s1348_s12 = sphi %s1414_s12, %s1760_s12   ;;  %s1344_s11 = sphi %s1412_s11, %s1762_s11   ;;  %s1340_s10 = sphi %s1410_s10, %s1764_s10   ;;  %s1336_s30 = sphi %s1408_s30, %s1763_s30  }
   0x6   : > { %s834_s14 = sadd.s32 4294967294, %s1348_s12   ;;  %s1433_s15 = sadd.s32 1, %s1348_s12  }
   0x7   : > { %1747 = sst [smem:[#allocation12_spill]] %s1433_s15  ;;  %s225_s16 = sadd.s32 1, %s1344_s11 }
   0x8   : > { %s222_s17 = ssub.s32 %s1348_s12, %s1433_s15  ;;  %p235_p0 = scmp.ne.s32.totalorder %s1344_s11, %s1340_s10 }
   0x9   : > { %p223_p1 = scmp.eq.s32.totalorder %s222_s17, 0  ;;  %p236_p2 = scmp.eq.s32.totalorder %s1429_s13, 1 }
   0xa   : > { %p241_p3 = scmp.ne.s32.totalorder %s1340_s10, %s1336_s30  ;;  %p242_p4 = scmp.eq.s32.totalorder %s834_s14, 1 }
   0xb   : > { %s1444_s18 = scalar_select %p223_p1, %s1344_s11, %s225_s16  }
   0xc   : > { %p1446_p5 = por %p236_p2, %p235_p0  ;;  %p1450_p6 = por %p242_p4, %p241_p3 }
   0xd   : > { %1748 = sst [smem:[#allocation13_spill]] %s1444_s18  ;;  %p835_p7 = scmp.ge.s32.totalorder %s1348_s12, 1 }
   0xe   : > { %s1749_s19 = scalar_select %p1446_p5, 1, 0 }
   0xf   : > { %s1750_s20 = scalar_select %p1450_p6, 1, 0 }
  0x10   : > { %p249_p8 = scmp.lt.s32.totalorder %s1348_s12, 3  ;;  %p1740_p9 = scmp.eq.s32.totalorder %s1429_s13, 0 }
  0x11   : > { %s1350_s22 = smov [#allocation2]   ;;  %s1351_s25 = smov [#allocation5]  }
  0x12   : > { %p1457_p10 = pnand %p835_p7, %p249_p8  ;;  %s267_s23 = sshll.u32 %s1350_s22, 4  ;;  %s268_s23 = int_to_ptr.vmem [resolvable:$true] %s267_s23 }
  0x13   : > { %s283_s26 = sshll.u32 %s1351_s25, 4  ;;  %s1222_s29 = scalar_lea.hbm %s1733_s3, 2048  ;;  %s1469_s26 = int_to_ptr.vmem [resolvable:$true] %s283_s26 }
  0x14   : > { %s1751_s21 = scalar_select %p1457_p10, 1, 0 }
  0x15   : > { %p1167_p11 = pneg %p1457_p10  ;;  %p1223_p13 = scmp.ne.s32.totalorder %s1733_s3, %s1222_s29 }
  0x16   : > { %p1229_p3 = scmp.lt.u32.totalorder %s1222_s29, %s1733_s3 }
  0x17   : > { %p1465_p12 = pnand %p1740_p9, %p1167_p11 }
  0x19   : > { %p1224_p0 = pneg %p1465_p12 }
  0x1b   : > { %p1225_p1 = pnand %p1224_p0, %p1223_p13 }
  0x1d   : > { %p1226_p2 = pneg %p1225_p1 }
  0x1f   : > { %p1231_p4 = pnand %p1229_p3, %p1226_p2 }
  0x21   : > { %1234 = shalt.err (!%p1231_p4)
}
  0x22   : > { %s1235_s25 = scalar_lea.vmem %s268_s23, 2048  ;;  %p1243_p9 = scmp.lt.s32.totalorder %s268_s23, %s268_s23 }
  0x23   : > { %p1236_p7 = scmp.ne.s32.totalorder %s268_s23, %s1235_s25  ;;  %p1244_p6 = scmp.lt.s32.totalorder %s1235_s25, %s1235_s25 }
  0x25   : > { %p1238_p8 = pnand %p1236_p7, %p1224_p0  ;;  %p1245_p5 = por %p1244_p6, %p1243_p9 }
  0x27   : > { %p1239_p11 = pneg %p1238_p8 }
  0x29   : > { %p1246_p10 = pnand %p1245_p5, %p1239_p11 }
  0x2b   : > { %1249 = shalt.err (!%p1246_p10)
}
  0x2c   : > { %s1352_s27 = smov 128   ;;  %s1353_s28 = smov 8  }
  0x2d   : > { %1170 = dma.hbm_to_vmem [thread:$0]  (!%p1465_p12), %s1733_s3, 2048, %s268_s23, [#allocation3], %s1352_s27, %s1352_s27, %s1353_s28  }
  0x2e   : > { %s1250_s22 = scalar_lea.hbm %s1735_s5, 2048 }
  0x2f   : > { %p1251_p13 = scmp.ne.s32.totalorder %s1735_s5, %s1250_s22  ;;  %p1257_p9 = scmp.lt.u32.totalorder %s1250_s22, %s1735_s5 }
  0x31   : > { %p1253_p5 = pnand %p1251_p13, %p1224_p0 }
  0x33   : > { %p1254_p6 = pneg %p1253_p5 }
  0x35   : > { %p1259_p10 = pnand %p1257_p9, %p1254_p6 }
  0x37   : > { %1262 = shalt.err (!%p1259_p10)
}
  0x38   : > { %s1263_s23 = scalar_lea.vmem %s1469_s26, 2048  ;;  %p1271_p4 = scmp.lt.s32.totalorder %s1469_s26, %s1469_s26 }
  0x39   : > { %p1264_p1 = scmp.ne.s32.totalorder %s1469_s26, %s1263_s23  ;;  %p1272_p7 = scmp.lt.s32.totalorder %s1263_s23, %s1263_s23 }
  0x3b   : > { %p1266_p2 = pnand %p1264_p1, %p1224_p0  ;;  %p1273_p8 = por %p1272_p7, %p1271_p4 }
  0x3d   : > { %p1267_p3 = pneg %p1266_p2 }
  0x3f   : > { %p1274_p11 = pnand %p1273_p8, %p1267_p3 }
  0x41   : > { %1277 = shalt.err (!%p1274_p11)
}
  0x42   : > { %1173 = dma.hbm_to_vmem [thread:$0]  (!%p1465_p12), %s1735_s5, 2048, %s1469_s26, [#allocation6], %s1352_s27, %s1352_s27, %s1353_s28  }
  0x43   : > { %p1753_p13 = scmp.ne.s32.totalorder %s1751_s21, 0 }
  0x44   : > { %p1754_p5 = scmp.eq.s32.totalorder (!%p1753_p13), %s1429_s13, 0 }
  0x45   : > { %315 = sbr.rel (%p1753_p13) target bundleno = 993 (0x3e1), region = 56 }
  0x4c   : > { %1323 = dma.done.wait (%p1754_p5), [#allocation3], 2048   ;;  %p1755_p0 = pmov %p1754_p5 }
  0x4e   : > { %1325 = vsyncadd (%p1755_p0), [#allocation3], 4294965248  ;;  %p1756_p6 = pmov %p1755_p0 }
  0x4f   : > { %p1757_p9 = pmov %p1755_p0 }
  0x50   : > { %1327 = dma.done.wait (%p1756_p6), [#allocation6], 2048  }
  0x51   : > { %1329 = vsyncadd (%p1757_p9), [#allocation6], 4294965248  ;;  %v1354_v0 = vmov 0.0|0.0   ;;  %vm1355_vm0 = vmmov 0   ;;  %v1356_v1 = vmov 0.0   ;;  %v361_v2 = vld [vmem:[%s1731_s1] sm:$0xff] }
  0x52   : > { %1061 = vmatprep.subr.bf16.mxu0 %v1354_v0  ;;  %953 = vmatprep.mubr.msk.f32.mxu0 %vm1355_vm0, %v1356_v1  ;;  %v362_v3 = vld [vmem:[%s1731_s1 + $0x8] sm:$0xff]  ;;  %v363_v4 = vld [vmem:[%s1731_s1 + $0x10] sm:$0xff]  ;;  %v364_v6 = vld [vmem:[%s1731_s1 + $0x18] sm:$0xff]  ;;  %p354_p12 = scmp.lt.s32.totalorder %s1429_s13, 1  ;;  %vm359_vm1 = vcmask 490496   ;;  %s351_s18 = sand.u32 1, %s1340_s10  }
  0x53   : > { %1085 = vmatprep.subr.bf16.mxu1 %v1354_v0  ;;  %988 = vmatprep.mubr.msk.f32.mxu1 %vm1355_vm0, %v1356_v1  ;;  %v1062_v5 = vpack.c.bf16 %v362_v3, %v361_v2  ;;  %v1065_v7 = vpack.c.bf16 %v364_v6, %v363_v4  ;;  %v365_v8 = vld [vmem:[%s1731_s1 + $0x20] sm:$0xff]  ;;  %v366_v9 = vld [vmem:[%s1731_s1 + $0x28] sm:$0xff]  ;;  %v459_v12 = vld [vmem:[#allocation2 + $0x10] sm:$0xff]  ;;  %s842_s21 = sshll.u32 %s351_s18, 3  ;;  %s850_s27 = sshll.u32 %s1429_s13, 7 }
  0x54   : > { %v457_v10 = vld [vmem:[#allocation2] sm:$0xff]  ;;  %v458_v11 = vld [vmem:[#allocation2 + $0x8] sm:$0xff]  ;;  %v460_v13 = vld [vmem:[#allocation2 + $0x18] sm:$0xff]  ;;  %v1068_v14 = vpack.c.bf16 %v366_v9, %v365_v8  ;;  %s355_s11 = scalar_select %p354_p12, %s1429_s13, 1 }
  0x55   : > { %1063 = vmatpush3.bf16.msra.mxu0 %v1062_v5  ;;  %v1086_v15 = vpack.c.bf16 %v458_v11, %v457_v10  ;;  %v367_v16 = vld [vmem:[%s1731_s1 + $0x30] sm:$0xff]  ;;  %v368_v17 = vld [vmem:[%s1731_s1 + $0x38] sm:$0xff]  ;;  %v1089_v18 = vpack.c.bf16 %v460_v13, %v459_v12  ;;  %v461_v19 = vld [vmem:[#allocation2 + $0x20] sm:$0xff]  ;;  %s353_s28 = scalar_lea.vmem [#allocation7], %s842_s21  ;;  %s1687_s17 = scalar_lea.hbm %s1739_s9, %s850_s27 }
  0x56   : > { %1064 = vmatprep.subr.bf16.mxu0 %v1354_v0  ;;  %v462_v20 = vld [vmem:[#allocation2 + $0x28] sm:$0xff]  ;;  %v1071_v21 = vpack.c.bf16 %v368_v17, %v367_v16  ;;  %v369_v22 = vld [vmem:[%s1731_s1 + $0x40] sm:$0xff]  ;;  %v463_v25 = vld [vmem:[#allocation2 + $0x30] sm:$0xff]  ;;  %s843_s26 = sshll.u32 %s355_s11, 3  ;;  %s740_s22 = scalar_lea.sflag [#allocation4], %s351_s18 }
  0x57   : > { %1087 = vmatpush3.bf16.msra.mxu1 %v1086_v15  ;;  %v370_v23 = vld [vmem:[%s1731_s1 + $0x48] sm:$0xff]  ;;  %v1092_v24 = vpack.c.bf16 %v462_v20, %v461_v19  ;;  %v464_v26 = vld [vmem:[#allocation2 + $0x38] sm:$0xff]  ;;  %v371_v28 = vld [vmem:[%s1731_s1 + $0x50] sm:$0xff]  ;;  %s357_s29 = scalar_lea.vmem %s1730_s0, %s843_s26  ;;  %p1758_p1 = scmp.ne.s32.totalorder %s1749_s19, 0 }
  0x58   : > { %1088 = vmatprep.subr.bf16.mxu1 %v1354_v0  ;;  %v1074_v27 = vpack.c.bf16 %v370_v23, %v369_v22  ;;  %v372_v29 = vld [vmem:[%s1731_s1 + $0x58] sm:$0xff]  ;;  %v1095_v30 = vpack.c.bf16 %v464_v26, %v463_v25  ;;  %v465_v31 = vld [vmem:[#allocation2 + $0x40] sm:$0xff]  ;;  %v466_v32 = vld [vmem:[#allocation2 + $0x48] sm:$0xff]  ;;  %s1357_s13 = smov [#allocation7]  }
  0x59   : > { %1066 = vmatpush3.bf16.msra.mxu0 %v1065_v7  ;;  %v1077_v33 = vpack.c.bf16 %v372_v29, %v371_v28  ;;  %v373_v34 = vld [vmem:[%s1731_s1 + $0x60] sm:$0xff]  ;;  %v374_v35 = vld [vmem:[%s1731_s1 + $0x68] sm:$0xff]  ;;  %v1098_v36 = vpack.c.bf16 %v466_v32, %v465_v31  ;;  %v467_v37 = vld [vmem:[#allocation2 + $0x50] sm:$0xff]  ;;  %s1282_s23 = sshll.u32 %s1357_s13, 4  ;;  %s1283_s23 = int_to_ptr.vmem [resolvable:$false] %s1282_s23 }
  0x5a   : > { %1067 = vmatprep.subr.bf16.mxu0 %v1354_v0  ;;  %v468_v38 = vld [vmem:[#allocation2 + $0x58] sm:$0xff]  ;;  %v1080_v39 = vpack.c.bf16 %v374_v35, %v373_v34  ;;  %v375_v40 = vld [vmem:[%s1731_s1 + $0x70] sm:$0xff]  ;;  %v469_v43 = vld [vmem:[#allocation2 + $0x60] sm:$0xff]  ;;  %s1284_s11 = scalar_lea.vmem %s1283_s23, 256 }
  0x5b   : > { %1090 = vmatpush3.bf16.msra.mxu1 %v1089_v18  ;;  %v376_v41 = vld [vmem:[%s1731_s1 + $0x78] sm:$0xff]  ;;  %v1101_v42 = vpack.c.bf16 %v468_v38, %v467_v37  ;;  %v470_v44 = vld [vmem:[#allocation2 + $0x68] sm:$0xff]  ;;  %v358_v47 = vld [vmem:[%s357_s29] sm:$0xff]  ;;  %s753_s29 = sshll.u32 %s353_s28, 4  ;;  %s1689_s29 = int_to_ptr.vmem [resolvable:$true] %s753_s29 }
  0x5c   : > { %1091 = vmatprep.subr.bf16.mxu1 %v1354_v0  ;;  %v1083_v45 = vpack.c.bf16 %v376_v41, %v375_v40  ;;  %v1104_v46 = vpack.c.bf16 %v470_v44, %v469_v43  ;;  %v471_v48 = vld [vmem:[#allocation2 + $0x70] sm:$0xff]  ;;  %v472_v49 = vld [vmem:[#allocation2 + $0x78] sm:$0xff]  ;;  %v551_v51 = vld [vmem:[#allocation5] sm:$0xff]  ;;  %s1278_s25 = scalar_lea.vmem %s1689_s29, 128  ;;  %p1285_p4 = scmp.lt.s32.totalorder %s1689_s29, %s1283_s23 }
  0x5d   : > { %1069 = vmatpush3.bf16.msra.mxu0 %v1068_v14  ;;  %v1107_v50 = vpack.c.bf16 %v472_v49, %v471_v48  ;;  %v552_v52 = vld [vmem:[#allocation5 + $0x8] sm:$0xff]  ;;  %v553_v53 = vld [vmem:[#allocation5 + $0x10] sm:$0xff]  ;;  %v554_v55 = vld [vmem:[#allocation5 + $0x18] sm:$0xff]  ;;  %p1279_p10 = scmp.ne.s32.totalorder %s1689_s29, %s1278_s25  ;;  %p1286_p7 = scmp.lt.s32.totalorder %s1284_s11, %s1278_s25 }
  0x5e   : > { %1070 = vmatprep.subr.bf16.mxu0 %v1354_v0  ;;  %v1110_v54 = vpack.c.bf16 %v552_v52, %v551_v51  ;;  %v1113_v56 = vpack.c.bf16 %v554_v55, %v553_v53  ;;  %v555_v57 = vld [vmem:[#allocation5 + $0x20] sm:$0xff]  ;;  %v556_v58 = vld [vmem:[#allocation5 + $0x28] sm:$0xff]  ;;  %v557_v60 = vld [vmem:[#allocation5 + $0x30] sm:$0xff] }
  0x5f   : > { %1093 = vmatpush3.bf16.msra.mxu1 %v1092_v24  ;;  %v1116_v59 = vpack.c.bf16 %v556_v58, %v555_v57  ;;  %v558_v61 = vld [vmem:[#allocation5 + $0x38] sm:$0xff]  ;;  %v559_v63 = vld [vmem:[#allocation5 + $0x40] sm:$0xff]  ;;  %v560_v2 = vld [vmem:[#allocation5 + $0x48] sm:$0xff]  ;;  %p1280_p2 = pnand %p1279_p10, %p1758_p1  ;;  %p1287_p8 = por %p1286_p7, %p1285_p4 }
  0x60   : > { %1094 = vmatprep.subr.bf16.mxu1 %v1354_v0  ;;  %v1119_v62 = vpack.c.bf16 %v558_v61, %v557_v60  ;;  %v1122_v3 = vpack.c.bf16 %v560_v2, %v559_v63  ;;  %v561_v4 = vld [vmem:[#allocation5 + $0x50] sm:$0xff]  ;;  %v562_v5 = vld [vmem:[#allocation5 + $0x58] sm:$0xff]  ;;  %v563_v7 = vld [vmem:[#allocation5 + $0x60] sm:$0xff] }
  0x61   : > { %1072 = vmatpush3.bf16.msra.mxu0 %v1071_v21  ;;  %v1125_v6 = vpack.c.bf16 %v562_v5, %v561_v4  ;;  %v564_v8 = vld [vmem:[#allocation5 + $0x68] sm:$0xff]  ;;  %v844_v10 = vld [vmem:[%s1732_s2] ss:$0 sm:$0xff]  ;;  %v565_v16 = vld [vmem:[#allocation5 + $0x70] sm:$0xff]  ;;  %p1281_p3 = pneg %p1280_p2 }
  0x62   : > { %1073 = vmatprep.subr.bf16.mxu0 %v1354_v0  ;;  %v1128_v9 = vpack.c.bf16 %v564_v8, %v563_v7  ;;  %v566_v17 = vld [vmem:[#allocation5 + $0x78] sm:$0xff]  ;;  %v645_v19 = vld [vmem:[%s1737_s7] sm:$0xff]  ;;  %v646_v20 = vld [vmem:[%s1737_s7 + $0x8] sm:$0xff] }
  0x63   : > { %1096 = vmatpush3.bf16.msra.mxu1 %v1095_v30  ;;  %v1131_v18 = vpack.c.bf16 %v566_v17, %v565_v16  ;;  %v647_v21 = vld [vmem:[%s1737_s7 + $0x10] sm:$0xff]  ;;  %v1134_v22 = vpack.c.bf16 %v646_v20, %v645_v19  ;;  %v649_v24 = vld [vmem:[%s1737_s7 + $0x20] sm:$0xff]  ;;  %v650_v25 = vld [vmem:[%s1737_s7 + $0x28] sm:$0xff]  ;;  %p1288_p11 = pnand %p1287_p8, %p1281_p3 }
  0x64   : > { %1097 = vmatprep.subr.bf16.mxu1 %v1354_v0  ;;  %v1140_v26 = vpack.c.bf16 %v650_v25, %v649_v24  ;;  %v652_v28 = vld [vmem:[%s1737_s7 + $0x38] sm:$0xff]  ;;  %v653_v30 = vld [vmem:[%s1737_s7 + $0x40] sm:$0xff]  ;;  %v654_v31 = vld [vmem:[%s1737_s7 + $0x48] sm:$0xff] }
  0x65   : > { %1075 = vmatpush3.bf16.msra.mxu0 %v1074_v27  ;;  %v651_v27 = vld [vmem:[%s1737_s7 + $0x30] sm:$0xff]  ;;  %v1146_v32 = vpack.c.bf16 %v654_v31, %v653_v30  ;;  %v656_v34 = vld [vmem:[%s1737_s7 + $0x58] sm:$0xff]  ;;  %v658_v37 = vld [vmem:[%s1737_s7 + $0x68] sm:$0xff] }
  0x66   : > { %1076 = vmatprep.subr.bf16.mxu0 %v1354_v0  ;;  %v1143_v29 = vpack.c.bf16 %v652_v28, %v651_v27  ;;  %v659_v44 = vld [vmem:[%s1737_s7 + $0x70] sm:$0xff]  ;;  %v848_v51 = vld [vmem:[%s1738_s8] ss:$0 sm:$0xff] }
  0x67   : > { %1099 = vmatpush3.bf16.msra.mxu1 %v1098_v36  ;;  %v657_v36 = vld [vmem:[%s1737_s7 + $0x60] sm:$0xff] }
  0x68   : > { %1100 = vmatprep.subr.bf16.mxu1 %v1354_v0  ;;  %v1152_v38 = vpack.c.bf16 %v658_v37, %v657_v36 }
  0x69   : > { %1078 = vmatpush3.bf16.msra.mxu0 %v1077_v33  ;;  %v655_v33 = vld [vmem:[%s1737_s7 + $0x50] sm:$0xff] }
  0x6a   : > { %1079 = vmatprep.subr.bf16.mxu0 %v1354_v0  ;;  %v1149_v35 = vpack.c.bf16 %v656_v34, %v655_v33 }
  0x6b   : > { %1102 = vmatpush3.bf16.msra.mxu1 %v1101_v42 }
  0x6c   : > { %1103 = vmatprep.subr.bf16.mxu1 %v1354_v0 }
  0x6d   : > { %1081 = vmatpush3.bf16.msra.mxu0 %v1080_v39  ;;  %v846_v39 = vld [vmem:[%s1734_s4] ss:$0 sm:$0xff] }
  0x6e   : > { %1082 = vmatprep.subr.bf16.mxu0 %v1354_v0 }
  0x6f   : > { %1105 = vmatpush3.bf16.msra.mxu1 %v1104_v46  ;;  %v847_v46 = vld [vmem:[%s1736_s6] ss:$0 sm:$0xff] }
  0x70   : > { %1106 = vmatprep.subr.bf16.mxu1 %v1354_v0 }
  0x71   : > { %1084 = vmatpush3.bf16.msra.mxu0 %v1083_v45  ;;  %v660_v45 = vld [vmem:[%s1737_s7 + $0x78] sm:$0xff] }
  0x72   : > { %1109 = vmatprep.subr.bf16.mxu0 %v1354_v0 }
  0x73   : > { %1108 = vmatpush3.bf16.msra.mxu1 %v1107_v50 }
  0x74   : > { %954 = vmatmul.mubr.msk.f32.vlgmr.msra.gmra.mrb[0].mxu0 %vm359_vm1, %v358_v47  ;;  %1133 = vmatprep.subr.bf16.mxu1 %v1354_v0 }
  0x75   : > { %1023 = vmatprep.mubr.msk.f32.mxu0 %vm1355_vm0, %v1356_v1  ;;  %1111 = vmatpush3.bf16.msra.mxu0 %v1110_v54 }
  0x76   : > { %1112 = vmatprep.subr.bf16.mxu0 %v1354_v0 }
  0x79   : > { %1114 = vmatpush3.bf16.msra.mxu0 %v1113_v56 }
  0x7a   : > { %1115 = vmatprep.subr.bf16.mxu0 %v1354_v0 }
  0x7d   : > { %1117 = vmatpush3.bf16.msra.mxu0 %v1116_v59 }
  0x7e   : > { %1118 = vmatprep.subr.bf16.mxu0 %v1354_v0 }
  0x81   : > { %1120 = vmatpush3.bf16.msra.mxu0 %v1119_v62 }
  0x82   : > { %1121 = vmatprep.subr.bf16.mxu0 %v1354_v0 }
  0x85   : > { %1123 = vmatpush3.bf16.msra.mxu0 %v1122_v3 }
  0x86   : > { %1124 = vmatprep.subr.bf16.mxu0 %v1354_v0 }
  0x89   : > { %1126 = vmatpush3.bf16.msra.mxu0 %v1125_v6 }
  0x8a   : > { %1127 = vmatprep.subr.bf16.mxu0 %v1354_v0 }
  0x8d   : > { %1129 = vmatpush3.bf16.msra.mxu0 %v1128_v9 }
  0x8e   : > { %1130 = vmatprep.subr.bf16.mxu0 %v1354_v0 }
  0x91   : > { %1132 = vmatpush3.bf16.msra.mxu0 %v1131_v18 }
 0x147   : > { %v450_v11 = vpop.f32.mrb[0].mxu0 }
 0x148   : > { %v451_v12 = vadd.f32 %v844_v10, %v450_v11  ;;  %v955_v13 = vpop.f32.mrb[1].mxu0 }
 0x14a   : > { %v455_v14 = vmul.f32 0.01, %v451_v12  ;;  %vm454_vm2 = vcmp.gt.f32.partialorder %v451_v12, 0.0 }
 0x14c   : > { %v456_v15 = vsel %vm454_vm2, %v451_v12, %v455_v14 }
 0x14d   : > { %989 = vmatmul.mubr.f32.vlgmr.msra.gmra.mrb[0].mxu1 %v456_v15 }
 0x14e   : > { %1058 = vmatprep.mubr.msk.f32.mxu1 %vm1355_vm0, %v1356_v1  ;;  %v648_v1 = vld [vmem:[%s1737_s7 + $0x18] sm:$0xff]  ;;  %1135 = vmatpush3.bf16.msra.mxu1 %v1134_v22 }
 0x14f   : > { %v1137_v23 = vpack.c.bf16 %v648_v1, %v647_v21  ;;  %1136 = vmatprep.subr.bf16.mxu1 %v1354_v0 }
 0x152   : > { %1138 = vmatpush3.bf16.msra.mxu1 %v1137_v23 }
 0x153   : > { %1139 = vmatprep.subr.bf16.mxu1 %v1354_v0 }
 0x156   : > { %1141 = vmatpush3.bf16.msra.mxu1 %v1140_v26 }
 0x157   : > { %1142 = vmatprep.subr.bf16.mxu1 %v1354_v0 }
 0x15a   : > { %1144 = vmatpush3.bf16.msra.mxu1 %v1143_v29 }
 0x15b   : > { %1145 = vmatprep.subr.bf16.mxu1 %v1354_v0 }
 0x15e   : > { %1147 = vmatpush3.bf16.msra.mxu1 %v1146_v32 }
 0x15f   : > { %1148 = vmatprep.subr.bf16.mxu1 %v1354_v0 }
 0x162   : > { %1150 = vmatpush3.bf16.msra.mxu1 %v1149_v35 }
 0x163   : > { %1151 = vmatprep.subr.bf16.mxu1 %v1354_v0 }
 0x166   : > { %1153 = vmatpush3.bf16.msra.mxu1 %v1152_v38 }
 0x167   : > { %1154 = vmatprep.subr.bf16.mxu1 %v1354_v0  ;;  %v1155_v0 = vpack.c.bf16 %v660_v45, %v659_v44 }
 0x16a   : > { %1156 = vmatpush3.bf16.msra.mxu1 %v1155_v0 }
 0x220   : > { %v546_v40 = vpop.f32.mrb[0].mxu1 }
 0x221   : > { %v547_v41 = vadd.f32 %v846_v39, %v546_v40  ;;  %v990_v42 = vpop.f32.mrb[1].mxu1 }
 0x223   : > { %v550_v43 = vmax.f32 %v547_v41, 0.0 }
 0x225   : > { %1024 = vmatmul.mubr.f32.vlgmr.msra.gmra.mrb[2].mxu0 %v550_v43 }
 0x2f8   : > { %v640_v47 = vpop.f32.mrb[2].mxu0 }
 0x2f9   : > { %v641_v48 = vadd.f32 %v847_v46, %v640_v47  ;;  %v1025_v49 = vpop.f32.mrb[3].mxu0 }
 0x2fb   : > { %v644_v50 = vmax.f32 %v641_v48, 0.0 }
 0x2fd   : > { %1059 = vmatmul.mubr.f32.vlgmr.msra.gmra.mrb[2].mxu1 %v644_v50 }
 0x3d0   : > { %v734_v52 = vpop.f32.mrb[2].mxu1 }
 0x3d1   : > { %v735_v53 = vadd.f32 %v848_v51, %v734_v52  ;;  %v1060_v54 = vpop.f32.mrb[3].mxu1 }
 0x3d3   : > { %738 = vst.msk [vmem:[%s353_s28] sm:$0xff] %vm359_vm1, %v735_v53 }
 0x3d4   : > { %1291 = shalt.err (!%p1288_p11)
}
 0x3d5   : > { %s1292_s15 = scalar_lea.hbm %s1687_s17, 128  ;;  %s1296_s24 = scalar_lea.hbm %s1739_s9, 256 }
 0x3d6   : > { %p1293_p13 = scmp.ne.s32.totalorder %s1687_s17, %s1292_s15  ;;  %p1297_p6 = scmp.lt.u32.totalorder %s1687_s17, %s1739_s9 }
 0x3d7   : > { %p1298_p9 = scmp.lt.u32.totalorder %s1296_s24, %s1292_s15  ;;  %p1300_p10 = scmp.lt.u32.totalorder %s1292_s15, %s1687_s17 }
 0x3d8   : > { %p1294_p5 = pnand %p1293_p13, %p1758_p1 }
 0x3d9   : > { %p1299_p12 = por %p1298_p9, %p1297_p6 }
 0x3da   : > { %p1295_p0 = pneg %p1294_p5 }
 0x3db   : > { %p1301_p2 = por %p1300_p10, %p1299_p12 }
 0x3dd   : > { %p1302_p3 = pnand %p1301_p2, %p1295_p0 }
 0x3df   : > { %1305 = shalt.err (!%p1302_p3)
}
 0x3e0   : > { %1165 = dma.vmem_to_hbm [thread:$0]  (%p1758_p1), %s1689_s29, 128, %s1687_s17, %s740_s22  }
 0x3e1 PF: > { %p1182_p4 = scmp.ge.s32.totalorder %s1348_s12, 2  ;;  %s765_s28 = sand.u32 1, %s1336_s30  }
 0x3e2   : > { %p1759_p7 = scmp.ne.s32.totalorder %s1750_s20, 0  ;;  %s766_s14 = scalar_lea.sflag [#allocation4], %s765_s28 }
 0x3e4   : > { %p1175_p8 = pnand %p1182_p4, %p1759_p7 }
 0x3e6   : > { %1331 = dma.done.wait (!%p1175_p8), %s766_s14, 128  }
 0x3e7   : > { %1333 = vsyncadd (!%p1175_p8), %s766_s14, 4294967168  ;;  %s1760_s12 = sld [smem:[#allocation12_spill]]  ;;  %s1761_s16 = sld [smem:[#allocation11_spill]] }
 0x3e8   : > { %s1762_s11 = sld [smem:[#allocation13_spill]]  ;;  %s1763_s30 = smov %s1340_s10 }
 0x3ed   : > { %p21_p11 = scmp.ge.s32.totalorder %s1760_s12, 4   ;;  %s1764_s10 = smov %s1761_s16 }
 0x3ef   :  { %23 = sbr.rel (!%p21_p11) target bundleno = 5 (0x5), region = 100 }
 0x3f6   :  { %771 = vsyncpa [#allocation3], 1 }
 0x3f7   :  { %773 = vsyncpa [#allocation3 + $0x1], 1 }
 0x3f8   :  { %774 = vsyncpa [#allocation6], 1 }
 0x3f9   :  { %775 = vsyncpa [#allocation4], 1 }
 0x3fa   :  { %777 = vsyncpa [#allocation4 + $0x1], 1 }

</bundles_post_ra>
